<compile_context>
chip_gen: v7x
topology: tpu7x:2x2x1
jax: 0.10.0
libtpu: 0.0.40
codegen_flags: <defaults>
</compile_context>

<pallas_src>
import jax
import jax.numpy as jnp
from jax import lax
from jax.experimental import pallas as pl
from jax.experimental.pallas import tpu as pltpu


# ----------------------------------------------------------------------------
# Small helpers
# ----------------------------------------------------------------------------
def _round_up(x, m):
    return (x + m - 1) // m * m


def _num_tensorcores():
    try:
        return max(1, int(getattr(jax.local_devices()[0], "num_cores", 1)))
    except Exception:
        return 1


def _vmem_limit(block_bytes):
    cap = 128 * 1024 * 1024
    try:
        info = pltpu.get_tpu_info()
        cap = int(getattr(info, "vmem_capacity_bytes", cap))
    except Exception:
        pass
    if cap < 48 * 1024 * 1024:           # bogus query result -> assume 128 MiB
        cap = 128 * 1024 * 1024
    ceiling = (cap * 7) // 8             # leave headroom for compiler scratch
    want = max(32 * 1024 * 1024, 2 * int(block_bytes) + 4 * 1024 * 1024)
    return int(max(16 * 1024 * 1024, min(ceiling, want)))


def bn_affine(gamma, beta, mean, var, eps=1e-5):
    scale = gamma / jnp.sqrt(var + eps)
    return scale, beta - mean * scale


def _pick_deconv_tile(m, dtype, target=512):
    """Largest row tile <= target that divides m (so no output slice is needed);
    only halves to guarantee >=2 grid steps when >1 TensorCore is present."""
    step = 16 if (dtype == jnp.bfloat16 or m % 16 == 0) else 8
    if m % step != 0:
        return None                      # caller pads (rare)
    divs = [d for d in range(step, min(target, m) + 1, step) if m % d == 0]
    if not divs:
        return m if m <= 4096 else None
    if _num_tensorcores() >= 2:
        multi = [d for d in divs if m // d >= 2]
        if multi:
            return multi[-1]
    return divs[-1]


# ----------------------------------------------------------------------------
# Kernel 1: deconv(2,2,0) + BN + ReLU as one dense lane-dense matmul.
#   out = relu(x @ (W*bn_scale) + shift);   acc in f32.
# ----------------------------------------------------------------------------
def _deconv_bn_relu_kernel(x_ref, w_ref, shift_ref, o_ref):
    acc = jnp.dot(x_ref[...], w_ref[...], preferred_element_type=jnp.float32)
    o_ref[...] = jnp.maximum(acc + shift_ref[...], 0.0).astype(o_ref.dtype)


def deconv_bn_relu(x2d, w_eff, shift, out_dtype, target_rows=512):
    """x2d: (M, Cin) pixel-major; w_eff: (Cin, 4*Cout) with BN scale folded in;
    shift: (1, 4*Cout) f32 (= deconv bias * scale + BN shift, tiled over kh,kw)."""
    M, K = x2d.shape
    N = w_eff.shape[1]
    tm = _pick_deconv_tile(M, x2d.dtype, target_rows)
    pad = 0
    if tm is None:
        # TODO(synk): this fallback costs one activation-sized HBM slice copy.
        Mp = _round_up(M, 16)
        pad = Mp - M
        x2d = jnp.pad(x2d, ((0, pad), (0, 0)))
        M = Mp
        tm = _pick_deconv_tile(M, x2d.dtype, target_rows) or M

    esz = jnp.dtype(x2d.dtype).itemsize
    block_bytes = (tm * K * esz + K * N * esz + N * 4
                   + tm * N * jnp.dtype(out_dtype).itemsize)

    out = pl.pallas_call(
        _deconv_bn_relu_kernel,
        out_shape=jax.ShapeDtypeStruct((M, N), out_dtype),
        grid_spec=pltpu.PrefetchScalarGridSpec(
            num_scalar_prefetch=0,
            grid=(M // tm,),
            in_specs=[
                pl.BlockSpec((tm, K), lambda i: (i, 0)),   # pixel-row tile
                pl.BlockSpec((K, N), lambda i: (0, 0)),    # dense weight (tiny)
                pl.BlockSpec((1, N), lambda i: (0, 0)),    # bias + BN shift
            ],
            out_specs=pl.BlockSpec((tm, N), lambda i: (i, 0)),
        ),
        compiler_params=pltpu.CompilerParams(
            dimension_semantics=("parallel",),
            vmem_limit_bytes=_vmem_limit(block_bytes),
        ),
    )(x2d, w_eff, shift)
    return out[:M - pad] if pad else out


# ----------------------------------------------------------------------------
# Kernel 2: 3x3 SAME conv + BN + ReLU (+dropout, + optional 2nd input).
# Activations live in a per-image zero-padded pixel-major slab:
#   (Nb, Qpad, C),  Qpad = pad_l + H2*W2 + pad_l,  pad_l = roundup(W2+1, 8),
# real pixel (r, j) at flat index pad_l + r*W2 + j, pad ring is zero.
# Tap (kh, kw) then reads the static window  ref[base + kh*W2 + kw : + H2*W2],
# base = pad_l - W2 - 1; only the dw column-wrap needs masking.
# ----------------------------------------------------------------------------
def _make_conv3x3_kernel(H2, W2, base, pad_l, has_skip, has_mask,
                         pad_output, inv_keep):
    HW = H2 * W2

    def kernel(*refs):
        it = iter(refs)
        h_ref = next(it)
        s_ref = next(it) if has_skip else None
        wh_ref = next(it)                       # (9, Ch, Cout), idx = kh*3+kw
        ws_ref = next(it) if has_skip else None
        shift_ref = next(it)                    # (1, Cout) f32
        m_ref = next(it) if has_mask else None  # (HW, Cout) {0,1} bf16
        o_ref = next(it)
        Cout = o_ref.shape[-1]

        def contrib(kw):
            acc = None
            for kh in range(3):
                start = base + kh * W2 + kw     # static offsets
                d = jnp.dot(h_ref[pl.ds(start, HW), :], wh_ref[kh * 3 + kw],
                            preferred_element_type=jnp.float32)
                if has_skip:
                    d = d + jnp.dot(s_ref[pl.ds(start, HW), :],
                                    ws_ref[kh * 3 + kw],
                                    preferred_element_type=jnp.float32)
                acc = d if acc is None else acc + d
            return acc

        col = lax.broadcasted_iota(jnp.int32, (HW, 1), 0) % W2
        not_first = (col != 0).astype(jnp.float32)       # kills kw=0 wrap
        not_last = (col != W2 - 1).astype(jnp.float32)   # kills kw=2 wrap

        acc = contrib(1) + not_first * contrib(0) + not_last * contrib(2)
        y = jnp.maximum(acc + shift_ref[...], 0.0)
        if has_mask:
            y = y * (m_ref[...].astype(jnp.float32) * inv_keep)
        y = y.astype(o_ref.dtype)

        if pad_output:
            zeros = jnp.zeros((pad_l, Cout), o_ref.dtype)
            o_ref[pl.ds(0, pad_l), :] = zeros
            o_ref[pl.ds(pad_l, HW), :] = y
            o_ref[pl.ds(pad_l + HW, pad_l), :] = zeros
        else:
            o_ref[...] = y

    return kernel


def conv3x3_bn_relu(h_pad, skip_pad, wh, ws, shift, mask, *, H2, W2,
                    pad_output, out_dtype, inv_keep=1.0):
    Nb, Qpad, Ch = h_pad.shape
    HW = H2 * W2
    pad_l = _round_up(W2 + 1, 8)
    assert Qpad == HW + 2 * pad_l, (Qpad, HW, pad_l)
    base = pad_l - W2 - 1
    Cout = wh.shape[-1]
    shift = shift.reshape(1, Cout).astype(jnp.float32)

    has_skip = skip_pad is not None
    has_mask = mask is not None

    args = [h_pad]
    in_specs = [pl.BlockSpec((pl.Squeezed(), Qpad, Ch), lambda n: (n, 0, 0))]
    if has_skip:
        Cs = skip_pad.shape[-1]
        args.append(skip_pad)
        in_specs.append(pl.BlockSpec((pl.Squeezed(), Qpad, Cs),
                                     lambda n: (n, 0, 0)))
    args.append(wh)
    in_specs.append(pl.BlockSpec((9, Ch, Cout), lambda n: (0, 0, 0)))
    if has_skip:
        args.append(ws)
        in_specs.append(pl.BlockSpec((9, skip_pad.shape[-1], Cout),
                                     lambda n: (0, 0, 0)))
    args.append(shift)
    in_specs.append(pl.BlockSpec((1, Cout), lambda n: (0, 0)))
    if has_mask:
        args.append(mask)
        in_specs.append(pl.BlockSpec((pl.Squeezed(), HW, Cout),
                                     lambda n: (n, 0, 0)))

    out_rows = Qpad if pad_output else HW
    out_spec = pl.BlockSpec((pl.Squeezed(), out_rows, Cout),
                            lambda n: (n, 0, 0))

    esz = jnp.dtype(h_pad.dtype).itemsize
    block_bytes = (Qpad * Ch * esz + 9 * Ch * Cout * esz + Cout * 4
                   + out_rows * Cout * jnp.dtype(out_dtype).itemsize
                   + (HW * Cout * 2 if has_mask else 0)
                   + ((Qpad + 9 * Cout) * skip_pad.shape[-1] * esz
                      if has_skip else 0))

    return pl.pallas_call(
        _make_conv3x3_kernel(H2, W2, base, pad_l, has_skip, has_mask,
                             pad_output, float(inv_keep)),
        out_shape=jax.ShapeDtypeStruct((Nb, out_rows, Cout), out_dtype),
        grid_spec=pltpu.PrefetchScalarGridSpec(
            num_scalar_prefetch=0,
            grid=(Nb,),
            in_specs=in_specs,
            out_specs=out_spec,
        ),
        compiler_params=pltpu.CompilerParams(
            dimension_semantics=("parallel",),
            vmem_limit_bytes=_vmem_limit(block_bytes),
        ),
    )(*args)


# ----------------------------------------------------------------------------
# Weight restructuring (tiny, done in the JAX wrapper; BN scale folded in)
# ----------------------------------------------------------------------------
def build_deconv_weight(wd, scale, dtype):
    """wd: (Cin, Cout, 2, 2) -> dense (Cin, 4*Cout), columns ordered (kh,kw,o)."""
    cin, cout = wd.shape[0], wd.shape[1]
    w = jnp.transpose(wd, (0, 2, 3, 1)) * scale[None, None, None, :]
    return w.reshape(cin, 4 * cout).astype(dtype)


def build_tap_weights(w, scale, dtype):
    """w: (Cout, Cin, 3, 3) -> (9, Cin, Cout) per-tap weights, idx = kh*3+kw."""
    cout, cin = w.shape[0], w.shape[1]
    w = w * scale[:, None, None, None]
    return jnp.transpose(w, (2, 3, 1, 0)).reshape(9, cin, cout).astype(dtype)


def _to_padded_pixels(x_flat, W2, dtype):
    """(Nb, H2*W2, C) -> (Nb, pad_l + H2*W2 + pad_l, C), zero pad ring."""
    pad_l = _round_up(W2 + 1, 8)
    return jnp.pad(x_flat.astype(dtype), ((0, 0), (pad_l, pad_l), (0, 0)))


# ----------------------------------------------------------------------------
# Up_DBR forward (Pallas path)
# ----------------------------------------------------------------------------
def up_dbr_forward(params, x_nchw, skip_nchw=None, dropout_masks=None,
                   dropout_p=0.25, compute_dtype=jnp.float32):
    cdt = compute_dtype
    Nb, Cin, H, W = x_nchw.shape
    Cout = params["bd"].shape[0]
    H2, W2 = 2 * H, 2 * W
    HW = H2 * W2
    inv_keep = float(1.0 / (1.0 - dropout_p))

    # --- deconv + bnd + relu: dense (Cin, 4*Cout) matmul over all pixels ---
    sd, td = bn_affine(**params["bnd"])
    wd_eff = build_deconv_weight(params["wd"], sd, cdt)
    shift_d = jnp.tile(params["bd"] * sd + td, 4).reshape(1, 4 * Cout)
    shift_d = shift_d.astype(jnp.float32)
    x2d = jnp.transpose(x_nchw, (0, 2, 3, 1)).reshape(Nb * H * W, Cin).astype(cdt)
    y = deconv_bn_relu(x2d, wd_eff, shift_d, out_dtype=cdt)      # (M, 4*Cout)

    # pixel-shuffle to upsampled NHWC, then pad to the conv slab layout.
    # TODO(synk): fold this shuffle+pad into the deconv kernel's stores.
    h = (y.reshape(Nb, H, W, 2, 2, Cout)
           .transpose(0, 1, 3, 2, 4, 5)
           .reshape(Nb, HW, Cout))
    h_pad = _to_padded_pixels(h, W2, cdt)

    # --- conv1 + bn1 + relu ---
    s1, t1 = bn_affine(**params["bn1"])
    shift1 = (params["b1"] * s1 + t1).reshape(1, Cout)

    if skip_nchw is None:
        # PyTorch path: relu(bn1(conv1(h))); no dropout, no conv2.
        w1h = build_tap_weights(params["w1"][:, :Cout], s1, cdt)
        h1 = conv3x3_bn_relu(h_pad, None, w1h, None, shift1, None,
                             H2=H2, W2=W2, pad_output=False,
                             out_dtype=jnp.float32)
        return jnp.transpose(h1.reshape(Nb, H2, W2, Cout), (0, 3, 1, 2))

    Cskip = skip_nchw.shape[1]
    skip = jnp.transpose(skip_nchw, (0, 2, 3, 1)).reshape(Nb, HW, Cskip)
    skip_pad = _to_padded_pixels(skip, W2, cdt)

    # conv1 sees cat([h, skip], ch): split its weight instead of concatenating.
    w1h = build_tap_weights(params["w1"][:, :Cout], s1, cdt)
    w1s = build_tap_weights(params["w1"][:, Cout:], s1, cdt)
    m1 = None if dropout_masks is None else dropout_masks[0].reshape(Nb, HW, Cout)
    h1_pad = conv3x3_bn_relu(h_pad, skip_pad, w1h, w1s, shift1, m1,
                             H2=H2, W2=W2, pad_output=True,
                             out_dtype=cdt, inv_keep=inv_keep)

    # --- conv2 + bn2 + relu + dropout ---
    s2, t2 = bn_affine(**params["bn2"])
    shift2 = (params["b2"] * s2 + t2).reshape(1, Cout)
    w2t = build_tap_weights(params["w2"], s2, cdt)
    m2 = None if dropout_masks is None else dropout_masks[1].reshape(Nb, HW, Cout)
    h2 = conv3x3_bn_relu(h1_pad, None, w2t, None, shift2, m2,
                         H2=H2, W2=W2, pad_output=False,
                         out_dtype=jnp.float32, inv_keep=inv_keep)
    return jnp.transpose(h2.reshape(Nb, H2, W2, Cout), (0, 3, 1, 2))


# ----------------------------------------------------------------------------
# Parameters / masks / pure-JAX reference
# ----------------------------------------------------------------------------
def init_params(key, cin, cmid, cout):
    k = jax.random.split(key, 9)

    def nrm(kk, shape, s=0.1):
        return s * jax.random.normal(kk, shape, jnp.float32)

    p = {
        "wd": nrm(k[0], (cin, cout, 2, 2)),   # ConvTranspose2d (IC, OC, kH, kW)
        "bd": nrm(k[1], (cout,)),
        "w1": nrm(k[2], (cout, cmid, 3, 3)),  # Conv2d (OC, IC, kH, kW)
        "b1": nrm(k[3], (cout,)),
        "w2": nrm(k[4], (cout, cout, 3, 3)),
        "b2": nrm(k[5], (cout,)),
    }
    for i, name in enumerate(["bnd", "bn1", "bn2"]):
        kk = jax.random.split(k[6 + i], 4)
        p[name] = dict(
            gamma=1.0 + nrm(kk[0], (cout,)),
            beta=nrm(kk[1], (cout,)),
            mean=nrm(kk[2], (cout,)),
            var=1.0 + 0.1 * jax.random.uniform(kk[3], (cout,), jnp.float32),
        )
    return p


def make_dropout_masks(key, nb, h2, w2, cout, p=0.25):
    k1, k2 = jax.random.split(key)
    shape = (nb, h2, w2, cout)
    m1 = jax.random.bernoulli(k1, 1.0 - p, shape).astype(jnp.bfloat16)
    m2 = jax.random.bernoulli(k2, 1.0 - p, shape).astype(jnp.bfloat16)
    return m1, m2


def up_dbr_reference(params, x_nchw, skip_nchw, dropout_masks, dropout_p=0.25):
    eps = 1e-5
    inv_keep = 1.0 / (1.0 - dropout_p)

    def bn(z, p):
        return (z - p["mean"]) / jnp.sqrt(p["var"] + eps) * p["gamma"] + p["beta"]

    def conv3x3(z, w, b):
        return lax.conv_general_dilated(
            z, w.transpose(2, 3, 1, 0), (1, 1), "SAME",
            dimension_numbers=("NHWC", "HWIO", "NHWC"),
            precision=lax.Precision.HIGHEST) + b

    x = jnp.transpose(x_nchw, (0, 2, 3, 1))
    Nb, H, W, _ = x.shape
    Cout = params["bd"].shape[0]
    y = (jnp.einsum("nhwc,cokl->nhkwlo", x, params["wd"],
                    precision=lax.Precision.HIGHEST)
           .reshape(Nb, 2 * H, 2 * W, Cout) + params["bd"])
    h = jax.nn.relu(bn(y, params["bnd"]))
    skip = jnp.transpose(skip_nchw, (0, 2, 3, 1))
    inp = jnp.concatenate([h, skip], axis=-1)
    h1 = jax.nn.relu(bn(conv3x3(inp, params["w1"], params["b1"]), params["bn1"]))
    h1 = h1 * dropout_masks[0].astype(jnp.float32) * inv_keep
    h2 = jax.nn.relu(bn(conv3x3(h1, params["w2"], params["b2"]), params["bn2"]))
    h2 = h2 * dropout_masks[1].astype(jnp.float32) * inv_keep
    return jnp.transpose(h2, (0, 3, 1, 2))


if __name__ == "__main__":
    key = jax.random.PRNGKey(0)
    ks = jax.random.split(key, 4)

    Nb, Cin, H, W = 2, 16, 8, 8
    Cout, Cskip = 32, 32
    Cmid = Cout + Cskip                  # conv1 input channels = deconv-out + skip

    x_nchw = jax.random.normal(ks[0], (Nb, Cin, H, W), jnp.float32)
    skip_nchw = jax.random.normal(ks[1], (Nb, Cskip, 2 * H, 2 * W), jnp.float32)
    params = init_params(ks[2], Cin, Cmid, Cout)
    masks = make_dropout_masks(ks[3], Nb, 2 * H, 2 * W, Cout, p=0.25)

    ref = up_dbr_reference(params, x_nchw, skip_nchw, masks)
    ref_scale = float(jnp.max(jnp.abs(ref)))

    # f32 path (tight tolerance).
    out_f32 = jax.block_until_ready(
        up_dbr_forward(params, x_nchw, skip_nchw, masks,
                       compute_dtype=jnp.float32))
    assert out_f32.shape == (Nb, Cout, 2 * H, 2 * W), out_f32.shape
    err_f32 = float(jnp.max(jnp.abs(out_f32 - ref)))
    assert err_f32 < 2e-3, f"f32 max abs err {err_f32}"

    # bf16 HBM/MXU path (loose tolerance, numerics differ by design).
    out_bf16 = jax.block_until_ready(
        up_dbr_forward(params, x_nchw, skip_nchw, masks,
                       compute_dtype=jnp.bfloat16))
    err_bf16 = float(jnp.max(jnp.abs(out_bf16 - ref)))
    assert err_bf16 < 0.03 * ref_scale + 0.03, f"bf16 max abs err {err_bf16}"

    print("KERNEL_OK")
</pallas_src>

<mosaic_0001>
module attributes {stable_mosaic.version = 11 : i64} {
  func.func @_deconv_bn_relu_kernel(%arg0: i32, %arg1: memref<128x16xf32, #tpu.memory_space<vmem>>, %arg2: memref<16x128xf32, #tpu.memory_space<vmem>>, %arg3: memref<1x128xf32, #tpu.memory_space<vmem>>, %arg4: memref<128x128xf32, #tpu.memory_space<vmem>>) attributes {dimension_semantics = [#tpu.dimension_semantics<parallel>], iteration_bounds = array<i64: 1>, scalar_prefetch = 0 : i64, scratch_operands = 0 : i64, tpu.core_type = #tpu.core_type<tc>, window_params = [{transform_indices = @transform_0, window_bounds = array<i64: 128, 16>}, {pipeline_mode = #tpu.pipeline_mode<synchronous>, transform_indices = @transform_1, window_bounds = array<i64: 16, 128>}, {pipeline_mode = #tpu.pipeline_mode<synchronous>, transform_indices = @transform_2, window_bounds = array<i64: 1, 128>}, {transform_indices = @transform_3, window_bounds = array<i64: 128, 128>}]} {
    %c0 = arith.constant 0 : index
    %c0_0 = arith.constant 0 : index
    %0 = vector.load %arg1[%c0, %c0_0] : memref<128x16xf32, #tpu.memory_space<vmem>>, vector<128x16xf32>
    %c0_1 = arith.constant 0 : index
    %c0_2 = arith.constant 0 : index
    %1 = vector.load %arg2[%c0_1, %c0_2] : memref<16x128xf32, #tpu.memory_space<vmem>>, vector<16x128xf32>
    %cst = arith.constant dense<0.000000e+00> : vector<128x128xf32>
    %2 = tpu.matmul %0, %1, %cst {dimension_numbers = #tpu.dot_dimension_numbers<[1], [0], [0], [1], [0, 0, 1, 1], [], []>} : vector<128x16xf32>, vector<16x128xf32>, vector<128x128xf32> -> vector<128x128xf32>
    %c0_3 = arith.constant 0 : index
    %c0_4 = arith.constant 0 : index
    %3 = vector.load %arg3[%c0_3, %c0_4] : memref<1x128xf32, #tpu.memory_space<vmem>>, vector<1x128xf32>
    %4 = vector.broadcast %3 : vector<1x128xf32> to vector<128x128xf32>
    %5 = arith.addf %2, %4 : vector<128x128xf32>
    %cst_5 = arith.constant 0.000000e+00 : f32
    %6 = vector.broadcast %cst_5 : f32 to vector<128x128xf32>
    %7 = arith.maximumf %5, %6 : vector<128x128xf32>
    %c0_6 = arith.constant 0 : index
    %c0_7 = arith.constant 0 : index
    %8 = vector.load %arg4[%c0_6, %c0_7] : memref<128x128xf32, #tpu.memory_space<vmem>>, vector<128x128xf32>
    tpu.vector_store %arg4[%c0_6, %c0_7], %7 {strides = array<i32>} : memref<128x128xf32, #tpu.memory_space<vmem>>, vector<128x128xf32>,
    return
  }
  func.func @transform_0(%arg0: i32) -> (i32, i32) {
    %c0_i32 = arith.constant 0 : i32
    %c0_i32_0 = arith.constant 0 : i32
    return %arg0, %c0_i32 : i32, i32
  }
  func.func @transform_1(%arg0: i32) -> (i32, i32) {
    %c0_i32 = arith.constant 0 : i32
    %c0_i32_0 = arith.constant 0 : i32
    %c0_i32_1 = arith.constant 0 : i32
    return %c0_i32, %c0_i32_0 : i32, i32
  }
  func.func @transform_2(%arg0: i32) -> (i32, i32) {
    %c0_i32 = arith.constant 0 : i32
    %c0_i32_0 = arith.constant 0 : i32
    %c0_i32_1 = arith.constant 0 : i32
    return %c0_i32, %c0_i32_0 : i32, i32
  }
  func.func @transform_3(%arg0: i32) -> (i32, i32) {
    %c0_i32 = arith.constant 0 : i32
    %c0_i32_0 = arith.constant 0 : i32
    return %arg0, %c0_i32 : i32, i32
  }
}

</mosaic_0001>

<bundles_post_ra>
// kernel: tpu_custom_call.1
= control target key start
LH: loop header
LB: loop body
LE: loop exit
PB: predicated region body
PF: predicated region fallthrough
CT: control target
= control target key end

     0   :  { %vm40_vm0 = vcmask 130048   ;;  %s486_s0 = inlined_call_operand.vmem [shape: f32[128,16], index: 0, kind: input, shape index: {}]   ;;  %s487_s1 = inlined_call_operand.vmem [shape: f32[16,128], index: 1, kind: input, shape index: {}]   ;;  %s488_s2 = inlined_call_operand.vmem [shape: f32[1,128], index: 2, kind: input, shape index: {}]   ;;  %s489_s3 = inlined_call_operand.hbm [shape: f32[128,128], index: 3, kind: output, shape index: {}]  }
   0x1   :  { %v31_v0 = vld [vmem:[%s487_s1] sm:$0xff]  ;;  %v32_v1 = vld [vmem:[%s487_s1 + $0x8] sm:$0xff]  ;;  %v17_v7 = vld [vmem:[%s486_s0 + $0x10] sm:$0xff] }
   0x2   :  { %v15_v2 = vld [vmem:[%s486_s0] sm:$0xff]  ;;  %v345_v3 = vpack.c.bf16 %v32_v1, %v31_v0  ;;  %v16_v5 = vld [vmem:[%s486_s0 + $0x8] sm:$0xff]  ;;  %v25_v8 = vld [vmem:[%s486_s0 + $0x50] sm:$0xff] }
   0x3   :  { %321 = vmatprep.mubr.msk.f32.mxu0 %vm40_vm0, %v15_v2  ;;  %v23_v4 = vld [vmem:[%s486_s0 + $0x40] sm:$0xff]  ;;  %v24_v6 = vld [vmem:[%s486_s0 + $0x48] sm:$0xff] }
   0x4   :  { %333 = vmatprep.mubr.msk.f32.mxu1 %vm40_vm0, %v23_v4  ;;  %346 = vmatprep.subr.bf16.mxu0 %v345_v3 }
   0x5   :  { %349 = vmatprep.subr.bf16.mxu1 %v345_v3  ;;  %348 = vmatpush3.bf16.msra.mxu0 %v345_v3 }
   0x6   :  { %350 = vmatpush3.bf16.msra.mxu1 %v345_v3 }
   0x7   :  { %8 = vsyncpa [#allocation3], 0  ;;  %v18_v9 = vld [vmem:[%s486_s0 + $0x18] sm:$0xff]  ;;  %v19_v11 = vld [vmem:[%s486_s0 + $0x20] sm:$0xff] }
   0x8   :  { %322 = vmatmul.mubr.msk.f32.vlgmr.msra.gmra.mrb[0].mxu0 %vm40_vm0, %v16_v5  ;;  %v26_v10 = vld [vmem:[%s486_s0 + $0x58] sm:$0xff]  ;;  %v27_v12 = vld [vmem:[%s486_s0 + $0x60] sm:$0xff]  ;;  %v20_v13 = vld [vmem:[%s486_s0 + $0x28] sm:$0xff] }
   0x9   :  { %334 = vmatmul.mubr.msk.f32.vlgmr.msra.gmra.mrb[0].mxu1 %vm40_vm0, %v24_v6  ;;  %324 = vmatprep.mubr.msk.f32.mxu0 %vm40_vm0, %v17_v7  ;;  %v28_v14 = vld [vmem:[%s486_s0 + $0x68] sm:$0xff]  ;;  %v21_v15 = vld [vmem:[%s486_s0 + $0x30] sm:$0xff]  ;;  %v22_v17 = vld [vmem:[%s486_s0 + $0x38] sm:$0xff] }
   0xa   :  { %336 = vmatprep.mubr.msk.f32.mxu1 %vm40_vm0, %v25_v8  ;;  %v29_v16 = vld [vmem:[%s486_s0 + $0x70] sm:$0xff]  ;;  %v30_v18 = vld [vmem:[%s486_s0 + $0x78] sm:$0xff]  ;;  %v282_v19 = vld [vmem:[%s488_s2] ss:$0 sm:$0xff]  ;;  %s378_s0 = smov [#allocation2]  }
   0xb   :  { %s271_s2 = sshll.u32 %s378_s0, 4  ;;  %s272_s2 = int_to_ptr.vmem [resolvable:$true] %s271_s2 }
   0xc   :  { %325 = vmatmul.mubr.msk.f32.gmra.mrb[2].mxu0 %vm40_vm0, %v18_v9  ;;  %s354_s21 = scalar_lea.vmem %s272_s2, 2048  ;;  %p359_p1 = scmp.lt.s32.totalorder %s272_s2, %s272_s2 }
   0xd   :  { %337 = vmatmul.mubr.msk.f32.gmra.mrb[2].mxu1 %vm40_vm0, %v26_v10  ;;  %327 = vmatprep.mubr.msk.f32.mxu0 %vm40_vm0, %v19_v11  ;;  %p355_p0 = scmp.ne.s32.totalorder %s272_s2, %s354_s21  ;;  %p360_p2 = scmp.lt.s32.totalorder %s354_s21, %s354_s21 }
   0xe   :  { %339 = vmatprep.mubr.msk.f32.mxu1 %vm40_vm0, %v27_v12 }
   0xf   :  { %p361_p3 = por %p360_p2, %p359_p1 }
  0x10   :  { %328 = vmatmul.mubr.msk.f32.gmra.mrb[4].mxu0 %vm40_vm0, %v20_v13 }
  0x11   :  { %340 = vmatmul.mubr.msk.f32.gmra.mrb[4].mxu1 %vm40_vm0, %v28_v14  ;;  %330 = vmatprep.mubr.msk.f32.mxu0 %vm40_vm0, %v21_v15  ;;  %p362_p4 = pnand %p361_p3, %p355_p0 }
  0x12   :  { %342 = vmatprep.mubr.msk.f32.mxu1 %vm40_vm0, %v29_v16 }
  0x14   :  { %331 = vmatmul.mubr.msk.f32.gmra.mrb[6].mxu0 %vm40_vm0, %v22_v17 }
  0x15   :  { %343 = vmatmul.mubr.msk.f32.gmra.mrb[6].mxu1 %vm40_vm0, %v30_v18 }
  0xdb   :  { %v323_v20 = vpop.f32.mrb[0].mxu0 }
  0xdc   :  { %v335_v21 = vpop.f32.mrb[0].mxu1  ;;  %v161_v22 = vadd.f32 %v323_v20, %v282_v19  ;;  %v155_v24 = vpop.f32.mrb[1].mxu0 }
  0xdd   :  { %v201_v23 = vadd.f32 %v335_v21, %v282_v19  ;;  %v195_v25 = vpop.f32.mrb[1].mxu1  ;;  %v156_v26 = vadd.f32 %v282_v19, %v155_v24 }
  0xde   :  { %v196_v27 = vadd.f32 %v282_v19, %v195_v25  ;;  %v235_v28 = vmax.f32 %v161_v22, 0.0 }
  0xdf   :  { %v243_v29 = vmax.f32 %v201_v23, 0.0  ;;  %v234_v30 = vmax.f32 %v156_v26, 0.0  ;;  %v326_v32 = vpop.f32.mrb[2].mxu0 }
  0xe0   :  { %v242_v31 = vmax.f32 %v196_v27, 0.0  ;;  %v338_v33 = vpop.f32.mrb[2].mxu1  ;;  %251 = vst [vmem:[#allocation2 + $0x8] sm:$0xff] %v235_v28  ;;  %v171_v34 = vadd.f32 %v326_v32, %v282_v19  ;;  %v165_v36 = vpop.f32.mrb[3].mxu0 }
  0xe1   :  { %259 = vst [vmem:[#allocation2 + $0x48] sm:$0xff] %v243_v29  ;;  %v211_v35 = vadd.f32 %v338_v33, %v282_v19  ;;  %v205_v37 = vpop.f32.mrb[3].mxu1  ;;  %250 = vst [vmem:[#allocation2] sm:$0xff] %v234_v30  ;;  %v166_v38 = vadd.f32 %v282_v19, %v165_v36 }
  0xe2   :  { %258 = vst [vmem:[#allocation2 + $0x40] sm:$0xff] %v242_v31  ;;  %v206_v39 = vadd.f32 %v282_v19, %v205_v37  ;;  %v237_v40 = vmax.f32 %v171_v34, 0.0 }
  0xe3   :  { %v245_v41 = vmax.f32 %v211_v35, 0.0  ;;  %v236_v42 = vmax.f32 %v166_v38, 0.0  ;;  %v329_v44 = vpop.f32.mrb[4].mxu0 }
  0xe4   :  { %v244_v43 = vmax.f32 %v206_v39, 0.0  ;;  %v341_v45 = vpop.f32.mrb[4].mxu1  ;;  %253 = vst [vmem:[#allocation2 + $0x18] sm:$0xff] %v237_v40  ;;  %v181_v46 = vadd.f32 %v329_v44, %v282_v19  ;;  %v175_v48 = vpop.f32.mrb[5].mxu0 }
  0xe5   :  { %261 = vst [vmem:[#allocation2 + $0x58] sm:$0xff] %v245_v41  ;;  %v221_v47 = vadd.f32 %v341_v45, %v282_v19  ;;  %v215_v49 = vpop.f32.mrb[5].mxu1  ;;  %252 = vst [vmem:[#allocation2 + $0x10] sm:$0xff] %v236_v42  ;;  %v176_v50 = vadd.f32 %v282_v19, %v175_v48 }
  0xe6   :  { %260 = vst [vmem:[#allocation2 + $0x50] sm:$0xff] %v244_v43  ;;  %v216_v51 = vadd.f32 %v282_v19, %v215_v49  ;;  %v239_v52 = vmax.f32 %v181_v46, 0.0 }
  0xe7   :  { %v247_v53 = vmax.f32 %v221_v47, 0.0  ;;  %v238_v54 = vmax.f32 %v176_v50, 0.0  ;;  %v332_v56 = vpop.f32.mrb[6].mxu0 }
  0xe8   :  { %v246_v55 = vmax.f32 %v216_v51, 0.0  ;;  %v344_v57 = vpop.f32.mrb[6].mxu1  ;;  %255 = vst [vmem:[#allocation2 + $0x28] sm:$0xff] %v239_v52  ;;  %v191_v58 = vadd.f32 %v332_v56, %v282_v19  ;;  %v185_v60 = vpop.f32.mrb[7].mxu0 }
  0xe9   :  { %263 = vst [vmem:[#allocation2 + $0x68] sm:$0xff] %v247_v53  ;;  %v231_v59 = vadd.f32 %v344_v57, %v282_v19  ;;  %v225_v61 = vpop.f32.mrb[7].mxu1  ;;  %254 = vst [vmem:[#allocation2 + $0x20] sm:$0xff] %v238_v54  ;;  %v186_v62 = vadd.f32 %v282_v19, %v185_v60 }
  0xea   :  { %262 = vst [vmem:[#allocation2 + $0x60] sm:$0xff] %v246_v55  ;;  %v226_v63 = vadd.f32 %v282_v19, %v225_v61  ;;  %v241_v0 = vmax.f32 %v191_v58, 0.0 }
  0xeb   :  { %v249_v1 = vmax.f32 %v231_v59, 0.0  ;;  %v240_v2 = vmax.f32 %v186_v62, 0.0 }
  0xec   :  { %v248_v3 = vmax.f32 %v226_v63, 0.0  ;;  %257 = vst [vmem:[#allocation2 + $0x38] sm:$0xff] %v241_v0 }
  0xed   :  { %265 = vst [vmem:[#allocation2 + $0x78] sm:$0xff] %v249_v1  ;;  %256 = vst [vmem:[#allocation2 + $0x30] sm:$0xff] %v240_v2 }
  0xee   :  { %264 = vst [vmem:[#allocation2 + $0x70] sm:$0xff] %v248_v3 }
  0xef   :  { %365 = shalt.err (!%p362_p4)
}
  0xf0   :  { %s366_s24 = scalar_lea.hbm %s489_s3, 2048 }
  0xf1   :  { %p367_p5 = scmp.ne.s32.totalorder %s489_s3, %s366_s24  ;;  %p370_p6 = scmp.lt.u32.totalorder %s366_s24, %s489_s3 }
  0xf3   :  { %p372_p7 = pnand %p370_p6, %p367_p5 }
  0xf5   :  { %375 = shalt.err (!%p372_p7)
}
  0xf6   :  { %s379_s29 = smov 128   ;;  %s380_s30 = smov 8  }
  0xf7   :  { %277 = dma.vmem_to_hbm [thread:$0]  %s272_s2, 2048, %s489_s3, [#allocation3], %s379_s29, %s379_s29, %s380_s30  }
  0xf8   :  { %376 = dma.done.wait [#allocation3], 2048  }
  0xf9   :  { %377 = vsyncadd [#allocation3], 4294965248 }
  0xfa   :  { %281 = vsyncpa [#allocation3], 1 }

</bundles_post_ra>
